<compile_context>
chip_gen: v5e
topology: v5e:2x2
jax: 0.10.0
libtpu: 0.0.40
codegen_flags: <defaults>
</compile_context>

<pallas_src>
import jax
import jax.numpy as jnp
from jax.experimental import pallas as pl
from jax.experimental.pallas import tpu as pltpu


MAX_TM = 2048  # rows per grid step; ~5 MiB working set at hidden=128


def _round_up(n, m):
    return ((n + m - 1) // m) * m


def _choose_tiling(batch, max_tm=MAX_TM, num_cores=1):
    """Return (TM, B_pad) so that padding is minimal and grid steps are few.

    * num_cores > 1 (v7x) and batch >= 512: exactly num_cores parallel steps.
    * batch <= max_tm: single tile, single grid step.
    * otherwise: steps = ceil(batch / max_tm), TM rounded up to 8 sublanes.
    """
    if num_cores > 1 and batch >= 512:
        tm = _round_up(pl.cdiv(batch, num_cores), 8)
        if tm <= max_tm:
            return tm, tm * num_cores
    b8 = _round_up(batch, 8)
    if b8 <= max_tm:
        return b8, b8
    steps = pl.cdiv(batch, max_tm)
    tm = _round_up(pl.cdiv(batch, steps), 8)
    return tm, tm * steps


def dqn_kernel(x_ref, w1_ref, b1_ref, w2_ref, b2_ref, w3_ref, b3_ref, o_ref):
    # fc1 + ReLU (bf16 operands into the MXU, fp32 accumulation).
    x = x_ref[...].astype(w1_ref.dtype)
    h1 = jnp.dot(x, w1_ref[...], preferred_element_type=jnp.float32)
    h1 = jnp.maximum(h1 + b1_ref[...], 0.0)
    # fc2 + ReLU.
    h2 = jnp.dot(h1.astype(w2_ref.dtype), w2_ref[...],
                 preferred_element_type=jnp.float32)
    h2 = jnp.maximum(h2 + b2_ref[...], 0.0)
    # fc3 (no activation — Q-values). w3 is lane-padded; slice to the true
    # output width before the (unpadded) store.
    out = jnp.dot(h2.astype(w3_ref.dtype), w3_ref[...],
                  preferred_element_type=jnp.float32)
    n_out = o_ref.shape[1]
    o_ref[...] = (out[:, :n_out] + b3_ref[...]).astype(o_ref.dtype)


def dqn_forward(x, params, output_size, *, num_cores=1):
    """Run the fused 3-layer MLP kernel.

    x: (B, input_size) float32 or bfloat16. params as produced by
    init_dqn_params (bf16 weights stored (in, out), fp32 biases, w3
    lane-padded, b3 unpadded). Returns (B, output_size) float32.
    num_cores: set to 2 on a 2-TensorCore chip (v7x) to split large batches
    across both cores.
    """
    w1, b1, w2, b2, w3, b3 = params
    B, in_size = x.shape

    TM, B_pad = _choose_tiling(B, num_cores=num_cores)
    if B_pad != B:
        x = jnp.pad(x, ((0, B_pad - B), (0, 0)))

    grid = (B_pad // TM,)

    def resident(shape):
        # Same block every grid step -> stays VMEM-resident (no re-DMA).
        return pl.BlockSpec(shape, lambda i: (0, 0))

    out = pl.pallas_call(
        dqn_kernel,
        out_shape=jax.ShapeDtypeStruct((B_pad, output_size), jnp.float32),
        grid=grid,
        in_specs=[
            pl.BlockSpec((TM, in_size), lambda i: (i, 0)),   # x: pipelined
            resident(w1.shape), resident(b1.shape),
            resident(w2.shape), resident(b2.shape),
            resident(w3.shape), resident(b3.shape),
        ],
        out_specs=pl.BlockSpec((TM, output_size), lambda i: (i, 0)),
        compiler_params=pltpu.CompilerParams(
            dimension_semantics=("parallel",),        # v7x megacore sharding
            vmem_limit_bytes=32 * 1024 * 1024,        # explicit, safe on all gens
        ),
    )(x, w1, b1, w2, b2, w3, b3)

    return out[:B] if B_pad != B else out


def init_dqn_params(key, input_size, output_size, hidden_size=128,
                    weight_dtype=jnp.bfloat16):
    """Deterministic init matching PyTorch nn.Linear default:
    U(-1/sqrt(fan_in), 1/sqrt(fan_in)) for both weight and bias.
    Weights stored (in, out); w3 zero-padded to a 128-lane multiple, b3 kept
    at the true output width (biases stay fp32)."""
    keys = jax.random.split(key, 6)
    out_pad = _round_up(output_size, 128)

    def linear(kw, kb, fan_in, fan_out, pad_w_to=None):
        bound = 1.0 / (fan_in ** 0.5)
        w = jax.random.uniform(kw, (fan_in, fan_out), jnp.float32, -bound, bound)
        b = jax.random.uniform(kb, (1, fan_out), jnp.float32, -bound, bound)
        if pad_w_to is not None and pad_w_to > fan_out:
            w = jnp.pad(w, ((0, 0), (0, pad_w_to - fan_out)))
        return w.astype(weight_dtype), b  # bias stays fp32

    w1, b1 = linear(keys[0], keys[1], input_size, hidden_size)
    w2, b2 = linear(keys[2], keys[3], hidden_size, hidden_size)
    w3, b3 = linear(keys[4], keys[5], hidden_size, output_size, pad_w_to=out_pad)
    return (w1, b1, w2, b2, w3, b3)


def dqn_reference(x, params, output_size):
    """Pure-JAX reference that models the kernel's bf16 activation/weight
    quantization with f32 accumulation (so it tracks the kernel closely;
    a full-f32 forward may differ by ~bf16 epsilon — acceptable for DQN)."""
    w1, b1, w2, b2, w3, b3 = params

    def mm(a, w):
        return jnp.dot(a.astype(jnp.bfloat16).astype(jnp.float32),
                       w.astype(jnp.float32))

    h1 = jnp.maximum(mm(x, w1) + b1, 0.0)
    h2 = jnp.maximum(mm(h1, w2) + b2, 0.0)
    return mm(h2, w3)[:, :output_size] + b3


if __name__ == "__main__":
    # Shapes consistent with DQN(input_size, output_size, hidden_size=128).
    input_size = 64
    output_size = 16
    hidden_size = 128

    key = jax.random.PRNGKey(0)
    k_params, k_x1, k_x2 = jax.random.split(key, 3)

    params = init_dqn_params(k_params, input_size, output_size, hidden_size)

    # Small single-tile batch (typical act() call).
    x_small = jax.random.normal(k_x1, (8, input_size), dtype=jnp.float32)
    out_small = jax.block_until_ready(dqn_forward(x_small, params, output_size))
    ref_small = dqn_reference(x_small, params, output_size)
    assert out_small.shape == (8, output_size)
    assert jnp.allclose(out_small, ref_small, atol=3e-2, rtol=3e-2)

    # Replay-buffer-sized batch: now a single grid step (TM=304, 4 pad rows).
    x_big = jax.random.normal(k_x2, (300, input_size), dtype=jnp.float32)
    out_big = jax.block_until_ready(dqn_forward(x_big, params, output_size))
    ref_big = dqn_reference(x_big, params, output_size)
    assert out_big.shape == (300, output_size)
    assert jnp.allclose(out_big, ref_big, atol=3e-2, rtol=3e-2)

    print("KERNEL_OK")
</pallas_src>

<mosaic_0001>
module attributes {stable_mosaic.version = 11 : i64} {
  func.func @dqn_kernel(%arg0: i32, %arg1: memref<8x64xf32, #tpu.memory_space<vmem>>, %arg2: memref<64x128xbf16, #tpu.memory_space<vmem>>, %arg3: memref<1x128xf32, #tpu.memory_space<vmem>>, %arg4: memref<128x128xbf16, #tpu.memory_space<vmem>>, %arg5: memref<1x128xf32, #tpu.memory_space<vmem>>, %arg6: memref<128x128xbf16, #tpu.memory_space<vmem>>, %arg7: memref<1x16xf32, #tpu.memory_space<vmem>>, %arg8: memref<8x16xf32, #tpu.memory_space<vmem>>) attributes {dimension_semantics = [#tpu.dimension_semantics<parallel>], iteration_bounds = array<i64: 1>, scalar_prefetch = 0 : i64, scratch_operands = 0 : i64, tpu.core_type = #tpu.core_type<tc>, window_params = [{transform_indices = @transform_0, window_bounds = array<i64: 8, 64>}, {pipeline_mode = #tpu.pipeline_mode<synchronous>, transform_indices = @transform_1, window_bounds = array<i64: 64, 128>}, {pipeline_mode = #tpu.pipeline_mode<synchronous>, transform_indices = @transform_2, window_bounds = array<i64: 1, 128>}, {pipeline_mode = #tpu.pipeline_mode<synchronous>, transform_indices = @transform_3, window_bounds = array<i64: 128, 128>}, {pipeline_mode = #tpu.pipeline_mode<synchronous>, transform_indices = @transform_4, window_bounds = array<i64: 1, 128>}, {pipeline_mode = #tpu.pipeline_mode<synchronous>, transform_indices = @transform_5, window_bounds = array<i64: 128, 128>}, {pipeline_mode = #tpu.pipeline_mode<synchronous>, transform_indices = @transform_6, window_bounds = array<i64: 1, 16>}, {transform_indices = @transform_7, window_bounds = array<i64: 8, 16>}]} {
    %c0 = arith.constant 0 : index
    %c0_0 = arith.constant 0 : index
    %0 = vector.load %arg1[%c0, %c0_0] : memref<8x64xf32, #tpu.memory_space<vmem>>, vector<8x64xf32>
    %1 = arith.truncf %0 : vector<8x64xf32> to vector<8x64xbf16>
    %c0_1 = arith.constant 0 : index
    %c0_2 = arith.constant 0 : index
    %2 = vector.load %arg2[%c0_1, %c0_2] : memref<64x128xbf16, #tpu.memory_space<vmem>>, vector<64x128xbf16>
    %cst = arith.constant dense<0.000000e+00> : vector<8x128xf32>
    %3 = tpu.matmul %1, %2, %cst {dimension_numbers = #tpu.dot_dimension_numbers<[1], [0], [0], [1], [0, 0, 1, 1], [], []>} : vector<8x64xbf16>, vector<64x128xbf16>, vector<8x128xf32> -> vector<8x128xf32>
    %c0_3 = arith.constant 0 : index
    %c0_4 = arith.constant 0 : index
    %4 = vector.load %arg3[%c0_3, %c0_4] : memref<1x128xf32, #tpu.memory_space<vmem>>, vector<1x128xf32>
    %5 = vector.broadcast %4 : vector<1x128xf32> to vector<8x128xf32>
    %6 = arith.addf %3, %5 : vector<8x128xf32>
    %cst_5 = arith.constant 0.000000e+00 : f32
    %7 = vector.broadcast %cst_5 : f32 to vector<8x128xf32>
    %8 = arith.maximumf %6, %7 : vector<8x128xf32>
    %9 = arith.truncf %8 : vector<8x128xf32> to vector<8x128xbf16>
    %c0_6 = arith.constant 0 : index
    %c0_7 = arith.constant 0 : index
    %10 = vector.load %arg4[%c0_6, %c0_7] : memref<128x128xbf16, #tpu.memory_space<vmem>>, vector<128x128xbf16>
    %cst_8 = arith.constant dense<0.000000e+00> : vector<8x128xf32>
    %11 = tpu.matmul %9, %10, %cst_8 {dimension_numbers = #tpu.dot_dimension_numbers<[1], [0], [0], [1], [0, 0, 1, 1], [], []>} : vector<8x128xbf16>, vector<128x128xbf16>, vector<8x128xf32> -> vector<8x128xf32>
    %c0_9 = arith.constant 0 : index
    %c0_10 = arith.constant 0 : index
    %12 = vector.load %arg5[%c0_9, %c0_10] : memref<1x128xf32, #tpu.memory_space<vmem>>, vector<1x128xf32>
    %13 = vector.broadcast %12 : vector<1x128xf32> to vector<8x128xf32>
    %14 = arith.addf %11, %13 : vector<8x128xf32>
    %cst_11 = arith.constant 0.000000e+00 : f32
    %15 = vector.broadcast %cst_11 : f32 to vector<8x128xf32>
    %16 = arith.maximumf %14, %15 : vector<8x128xf32>
    %17 = arith.truncf %16 : vector<8x128xf32> to vector<8x128xbf16>
    %c0_12 = arith.constant 0 : index
    %c0_13 = arith.constant 0 : index
    %18 = vector.load %arg6[%c0_12, %c0_13] : memref<128x128xbf16, #tpu.memory_space<vmem>>, vector<128x128xbf16>
    %cst_14 = arith.constant dense<0.000000e+00> : vector<8x128xf32>
    %19 = tpu.matmul %17, %18, %cst_14 {dimension_numbers = #tpu.dot_dimension_numbers<[1], [0], [0], [1], [0, 0, 1, 1], [], []>} : vector<8x128xbf16>, vector<128x128xbf16>, vector<8x128xf32> -> vector<8x128xf32>
    %20 = vector.extract_strided_slice %19 {offsets = [0, 0], sizes = [8, 16], strides = [1, 1]} : vector<8x128xf32> to vector<8x16xf32>
    %c0_15 = arith.constant 0 : index
    %c0_16 = arith.constant 0 : index
    %21 = vector.load %arg7[%c0_15, %c0_16] : memref<1x16xf32, #tpu.memory_space<vmem>>, vector<1x16xf32>
    %22 = vector.broadcast %21 : vector<1x16xf32> to vector<8x16xf32>
    %23 = arith.addf %20, %22 : vector<8x16xf32>
    %c0_17 = arith.constant 0 : index
    %c0_18 = arith.constant 0 : index
    %24 = vector.load %arg8[%c0_17, %c0_18] : memref<8x16xf32, #tpu.memory_space<vmem>>, vector<8x16xf32>
    tpu.vector_store %arg8[%c0_17, %c0_18], %23 {strides = array<i32>} : memref<8x16xf32, #tpu.memory_space<vmem>>, vector<8x16xf32>,
    return
  }
  func.func @transform_0(%arg0: i32) -> (i32, i32) {
    %c0_i32 = arith.constant 0 : i32
    %c0_i32_0 = arith.constant 0 : i32
    return %arg0, %c0_i32 : i32, i32
  }
  func.func @transform_1(%arg0: i32) -> (i32, i32) {
    %c0_i32 = arith.constant 0 : i32
    %c0_i32_0 = arith.constant 0 : i32
    %c0_i32_1 = arith.constant 0 : i32
    return %c0_i32, %c0_i32_0 : i32, i32
  }
  func.func @transform_2(%arg0: i32) -> (i32, i32) {
    %c0_i32 = arith.constant 0 : i32
    %c0_i32_0 = arith.constant 0 : i32
    %c0_i32_1 = arith.constant 0 : i32
    return %c0_i32, %c0_i32_0 : i32, i32
  }
  func.func @transform_3(%arg0: i32) -> (i32, i32) {
    %c0_i32 = arith.constant 0 : i32
    %c0_i32_0 = arith.constant 0 : i32
    %c0_i32_1 = arith.constant 0 : i32
    return %c0_i32, %c0_i32_0 : i32, i32
  }
  func.func @transform_4(%arg0: i32) -> (i32, i32) {
    %c0_i32 = arith.constant 0 : i32
    %c0_i32_0 = arith.constant 0 : i32
    %c0_i32_1 = arith.constant 0 : i32
    return %c0_i32, %c0_i32_0 : i32, i32
  }
  func.func @transform_5(%arg0: i32) -> (i32, i32) {
    %c0_i32 = arith.constant 0 : i32
    %c0_i32_0 = arith.constant 0 : i32
    %c0_i32_1 = arith.constant 0 : i32
    return %c0_i32, %c0_i32_0 : i32, i32
  }
  func.func @transform_6(%arg0: i32) -> (i32, i32) {
    %c0_i32 = arith.constant 0 : i32
    %c0_i32_0 = arith.constant 0 : i32
    %c0_i32_1 = arith.constant 0 : i32
    return %c0_i32, %c0_i32_0 : i32, i32
  }
  func.func @transform_7(%arg0: i32) -> (i32, i32) {
    %c0_i32 = arith.constant 0 : i32
    %c0_i32_0 = arith.constant 0 : i32
    return %arg0, %c0_i32 : i32, i32
  }
}

</mosaic_0001>

<bundles_post_ra>
// kernel: tpu_custom_call.1
= control target key start
LH: loop header
LB: loop body
LE: loop exit
PB: predicated region body
PF: predicated region fallthrough
CT: control target
= control target key end

     0   :  { %12 = vsyncpa [#allocation3], 0  ;;  %s642_s0 = inlined_call_operand.hbm [shape: f32[8,64], index: 0, kind: input, shape index: {}]   ;;  %s643_s1 = inlined_call_operand.hbm [shape: bf16[64,128], index: 1, kind: input, shape index: {}]   ;;  %s644_s2 = inlined_call_operand.vmem [shape: f32[1,128], index: 2, kind: input, shape index: {}]   ;;  %s645_s3 = inlined_call_operand.hbm [shape: bf16[128,128], index: 3, kind: input, shape index: {}]   ;;  %s646_s4 = inlined_call_operand.vmem [shape: f32[1,128], index: 4, kind: input, shape index: {}]   ;;  %s647_s5 = inlined_call_operand.hbm [shape: bf16[128,128], index: 5, kind: input, shape index: {}]   ;;  %s648_s6 = inlined_call_operand.vmem [shape: f32[1,16], index: 6, kind: input, shape index: {}]   ;;  %s649_s7 = inlined_call_operand.hbm [shape: f32[8,16], index: 7, kind: output, shape index: {}]  }
   0x1   :  { %13 = vsyncpa [#allocation6], 0 }
   0x2   :  { %14 = vsyncpa [#allocation9], 0  ;;  %s31_s26 = sshll.u32 %s643_s1, 4  ;;  %s32_s26 = int_to_ptr.hbm [resolvable:$true] %s31_s26 }
   0x3   :  { %15 = vsyncpa [#allocation4], 0  ;;  %s571_s27 = smov [#allocation5]   ;;  %s21_s8 = sshll.u32 %s642_s0, 4  ;;  %s22_s8 = int_to_ptr.hbm [resolvable:$true] %s21_s8 }
   0x4   :  { %s33_s28 = sshll.u32 %s571_s27, 4  ;;  %s572_s9 = smov 64   ;;  %s34_s28 = int_to_ptr.vmem [resolvable:$true] %s33_s28 }
   0x5   :  { %s573_s10 = smov 4   ;;  %s574_s11 = smov [#allocation2]  }
   0x6   :  { %39 = dma.hbm_to_vmem [thread:$0]  %s32_s26, 512, %s34_s28, [#allocation6], %s572_s9, %s572_s9, %s573_s10  }
   0x7   :  { %s23_s12 = sshll.u32 %s574_s11, 4  ;;  %s46_s15 = sshll.u32 %s645_s3, 4  ;;  %s24_s12 = int_to_ptr.vmem [resolvable:$true] %s23_s12  ;;  %s47_s15 = int_to_ptr.hbm [resolvable:$true] %s46_s15 }
   0x8   :  { %26 = dma.hbm_to_vmem [thread:$0]  %s22_s8, 128, %s24_s12, [#allocation3]  }
   0x9   :  { %s61_s17 = sshll.u32 %s647_s5, 4  ;;  %s575_s18 = smov [#allocation7]   ;;  %s62_s17 = int_to_ptr.hbm [resolvable:$true] %s61_s17 }
   0xa   :  { %s48_s19 = sshll.u32 %s575_s18, 4  ;;  %s576_s0 = smov [#allocation8]   ;;  %s49_s19 = int_to_ptr.vmem [resolvable:$true] %s48_s19 }
   0xb   :  { %54 = dma.hbm_to_vmem [thread:$0]  %s47_s15, 1024, %s49_s19, [#allocation6], %s572_s9, %s572_s9, %s573_s10  }
   0xc   :  { %s63_s20 = sshll.u32 %s576_s0, 4  ;;  %s64_s20 = int_to_ptr.vmem [resolvable:$true] %s63_s20 }
   0xd   :  { %69 = dma.hbm_to_vmem [thread:$0]  %s62_s17, 1024, %s64_s20, [#allocation9], %s572_s9, %s572_s9, %s573_s10  }
   0xe   :  { %563 = dma.done.wait [#allocation3], 128  }
   0xf   :  { %564 = vsyncadd [#allocation3], 4294967168 }
  0x10   :  { %565 = dma.done.wait [#allocation6], 1536  }
  0x11   :  { %566 = vsyncadd [#allocation6], 4294965760 }
  0x12   :  { %567 = dma.done.wait [#allocation9], 1024  }
  0x13   :  { %568 = vsyncadd [#allocation9], 4294966272  ;;  %v416_v0 = vld [vmem:[#allocation5 + $0x18] sm:$0xff]  ;;  %v415_v2 = vld [vmem:[#allocation5 + $0x10] sm:$0xff]  ;;  %vm127_vm0 = vcmask 523264   ;;  %s577_s24 = smov [#allocation10]  }
  0x14   :  { %v424_v1 = vld [vmem:[#allocation7 + $0x38] sm:$0xff]  ;;  %135 = vmatpush.bf16.msra.mxu0 %v416_v0  ;;  %v423_v3 = vld [vmem:[#allocation7 + $0x30] sm:$0xff]  ;;  %v414_v4 = vld [vmem:[#allocation5 + $0x8] sm:$0xff]  ;;  %s318_s25 = sshll.u32 %s577_s24, 4  ;;  %s320_s28 = sshll.u32 %s649_s7, 4  ;;  %vm311_vm1 = vcmask 130048   ;;  %s319_s25 = int_to_ptr.vmem [resolvable:$true] %s318_s25  ;;  %s321_s28 = int_to_ptr.hbm [resolvable:$true] %s320_s28 }
  0x15   :  { %214 = vmatpush.bf16.msra.mxu1 %v424_v1  ;;  %v422_v5 = vld [vmem:[#allocation7 + $0x28] sm:$0xff]  ;;  %v413_v6 = vld [vmem:[#allocation5] sm:$0xff]  ;;  %v89_v7 = vld [vmem:[#allocation2] sm:$0xff] }
  0x16   :  { %v421_v8 = vld [vmem:[#allocation7 + $0x20] sm:$0xff]  ;;  %v90_v9 = vpack.c.bf16 %v89_v7, %v89_v7  ;;  %v420_v10 = vld [vmem:[#allocation7 + $0x18] sm:$0xff]  ;;  %v419_v11 = vld [vmem:[#allocation7 + $0x10] sm:$0xff] }
  0x17   :  { %v418_v12 = vld [vmem:[#allocation7 + $0x8] sm:$0xff]  ;;  %v417_v13 = vld [vmem:[#allocation7] sm:$0xff]  ;;  %v432_v14 = vld [vmem:[#allocation8 + $0x38] sm:$0xff] }
  0x18   :  { %136 = vmatpush.bf16.msra.mxu0 %v415_v2  ;;  %293 = vmatpush.bf16.msra.mxu2 %v432_v14  ;;  %v431_v15 = vld [vmem:[#allocation8 + $0x30] sm:$0xff]  ;;  %v430_v16 = vld [vmem:[#allocation8 + $0x28] sm:$0xff]  ;;  %v429_v17 = vld [vmem:[#allocation8 + $0x20] sm:$0xff] }
  0x19   :  { %215 = vmatpush.bf16.msra.mxu1 %v423_v3  ;;  %v428_v18 = vld [vmem:[#allocation8 + $0x18] sm:$0xff]  ;;  %v427_v19 = vld [vmem:[#allocation8 + $0x10] sm:$0xff]  ;;  %v426_v26 = vld [vmem:[#allocation8 + $0x8] sm:$0xff] }
  0x1a   :  { %v440_v20 = vld [vmem:[%s644_s2] ss:$0 sm:$0xff]  ;;  %v425_v27 = vld [vmem:[#allocation8] sm:$0xff] }
  0x1b   :  { %v441_v28 = vld [vmem:[%s646_s4] ss:$0 sm:$0xff] }
  0x1c   :  { %137 = vmatpush.bf16.msra.mxu0 %v414_v4  ;;  %294 = vmatpush.bf16.msra.mxu2 %v431_v15  ;;  %v442_v34 = vld [vmem:[%s648_s6] ss:$0 sm:$0xff] }
  0x1d   :  { %216 = vmatpush.bf16.msra.mxu1 %v422_v5 }
  0x20   :  { %138 = vmatpush.bf16.msra.mxu0 %v413_v6  ;;  %295 = vmatpush.bf16.msra.mxu2 %v430_v16 }
  0x21   :  { %217 = vmatpush.bf16.msra.mxu1 %v421_v8 }
  0x23   :  { %348 = vmatmul.msk.bf16.vlgmr.msra.gmra.mxu0 %vm127_vm0, %v90_v9 }
  0x24   :  { %296 = vmatpush.bf16.msra.mxu2 %v429_v17 }
  0x25   :  { %218 = vmatpush.bf16.msra.mxu1 %v420_v10 }
  0x28   :  { %297 = vmatpush.bf16.msra.mxu2 %v428_v18 }
  0x29   :  { %219 = vmatpush.bf16.msra.mxu1 %v419_v11 }
  0x2c   :  { %298 = vmatpush.bf16.msra.mxu2 %v427_v19 }
  0x2d   :  { %220 = vmatpush.bf16.msra.mxu1 %v418_v12 }
  0x30   :  { %299 = vmatpush.bf16.msra.mxu2 %v426_v26 }
  0x31   :  { %221 = vmatpush.bf16.msra.mxu1 %v417_v13 }
  0x34   :  { %300 = vmatpush.bf16.msra.mxu2 %v425_v27 }
  0xa0   :  { %v140_v21 = vpop.f32.mrf.mxu0 }
  0xa1   :  { %v141_v22 = vadd.f32 %v440_v20, %v140_v21 }
  0xa3   :  { %v144_v23 = vmax.f32 %v141_v22, 0.0 }
  0xa5   :  { %v145_v24 = vpack.c.bf16 %v144_v23, %v144_v23 }
  0xa7   :  { %222 = vmatmul.bf16.vlgmr.msra.gmra.mxu1 %v145_v24 }
  0xa8   :  { %v142_v25 = vpop.f32.mrf.mxu0 }
 0x124   :  { %v223_v29 = vpop.f32.mrf.mxu1 }
 0x125   :  { %v224_v30 = vadd.f32 %v441_v28, %v223_v29 }
 0x127   :  { %v227_v31 = vmax.f32 %v224_v30, 0.0 }
 0x129   :  { %v228_v32 = vpack.c.bf16 %v227_v31, %v227_v31 }
 0x12b   :  { %301 = vmatmul.bf16.vlgmr.msra.gmra.mxu2 %v228_v32 }
 0x12c   :  { %v225_v33 = vpop.f32.mrf.mxu1 }
 0x1ae   :  { %v302_v35 = vpop.f32.mrf.mxu2 }
 0x1af   :  { %v310_v36 = vadd.f32 %v442_v34, %v302_v35 }
 0x1b1   :  { %312 = vst.msk [vmem:[#allocation10] sm:$0xff] %vm311_vm1, %v310_v36 }
 0x1b2   :  { %323 = dma.vmem_to_hbm [thread:$0]  %s319_s25, 128, %s321_s28, [#allocation4]  }
 0x1b6   :  { %v304_v37 = vpop.f32.mrf.mxu2 }
 0x1b7   :  { %569 = dma.done.wait [#allocation4], 128  }
 0x1b8   :  { %570 = vsyncadd [#allocation4], 4294967168 }
 0x1b9   :  { %328 = vsyncpa [#allocation3], 1 }
 0x1ba   :  { %329 = vsyncpa [#allocation6], 1 }
 0x1bb   :  { %330 = vsyncpa [#allocation9], 1 }
 0x1bc   :  { %331 = vsyncpa [#allocation4], 1 }

</bundles_post_ra>
